<compile_context>
chip_gen: v7x
topology: tpu7x:2x2x1
jax: 0.10.0
libtpu: 0.0.40
codegen_flags: <defaults>
</compile_context>

<pallas_src>
import jax
import jax.numpy as jnp
from jax.experimental import pallas as pl
from jax.experimental.pallas import tpu as pltpu


def decoder_kernel(v_ref, w_ref, b_ref, o_ref):
    # bf16 x bf16 MXU matmul with f32 accumulation, then bias + sigmoid on the
    # VPU/EUP in f32, one cast at the store (lane-dense f32 output tile).
    z = jnp.dot(v_ref[...], w_ref[...], preferred_element_type=jnp.float32)
    z = z + b_ref[...]                                  # (tm, tn) + (1, tn)
    o_ref[...] = jax.nn.sigmoid(z).astype(o_ref.dtype)


def _round_up(x, m):
    return ((x + m - 1) // m) * m


def _pick_tn(out_dim, max_tn):
    """Largest multiple of 128 that divides out_dim and is <= max_tn.

    Falls back to the full out_dim (a full-extent block is always legal).
    """
    best = None
    t = 128
    while t <= min(out_dim, max_tn):
        if out_dim % t == 0:
            best = t
        t += 128
    return best if best is not None else out_dim


def decoder_forward(v, W, b, img_c, img_w, img_h, *, max_tm=256, max_tn=2048):
    """v: (B, E) f32, W: (E, C*W*H) f32, b: (C*W*H,) f32 -> (B, C, W, H) f32."""
    B, E = v.shape
    out_dim = img_c * img_w * img_h
    assert W.shape == (E, out_dim)

    tn = _pick_tn(out_dim, max_tn)
    # Batch tile: cover the whole (padded) batch if it fits the cap, so the
    # weight matrix is streamed from HBM as few times as possible.
    tm = min(_round_up(B, 8), max(8, _round_up(max_tm, 8)))
    B_pad = _round_up(B, tm)
    if B_pad != B:
        v = jnp.pad(v, ((0, B_pad - B), (0, 0)))

    # One-time dtype prep outside the grid: bf16 activations + weights halve
    # HBM traffic for the weight-streaming-bound matmul.
    v_bf16 = v.astype(jnp.bfloat16)
    W_bf16 = W.astype(jnp.bfloat16)
    b2d = jnp.asarray(b, dtype=jnp.float32).reshape(1, out_dim)

    grid = (B_pad // tm, out_dim // tn)

    cost = pl.CostEstimate(
        flops=2 * B_pad * E * out_dim,
        transcendentals=B_pad * out_dim,                # sigmoid exp
        bytes_accessed=(2 * B_pad * E                   # v (bf16)
                        + 2 * E * out_dim               # W (bf16)
                        + 4 * out_dim                   # b (f32)
                        + 4 * B_pad * out_dim),         # out (f32)
    )

    flat = pl.pallas_call(
        decoder_kernel,
        out_shape=jax.ShapeDtypeStruct((B_pad, out_dim), jnp.float32),
        grid_spec=pltpu.PrefetchScalarGridSpec(
            num_scalar_prefetch=0,
            grid=grid,
            in_specs=[
                pl.BlockSpec((tm, E), lambda i, j: (i, 0)),   # v tile (resident-ish)
                pl.BlockSpec((E, tn), lambda i, j: (0, j)),   # W tile (streamed)
                pl.BlockSpec((1, tn), lambda i, j: (0, j)),   # bias tile
            ],
            out_specs=pl.BlockSpec((tm, tn), lambda i, j: (i, j)),
        ),
        compiler_params=pltpu.CompilerParams(
            dimension_semantics=("parallel", "parallel"),
        ),
        cost_estimate=cost,
    )(v_bf16, W_bf16, b2d)

    # Glue: drop batch padding, reshape flat pixels back to NCHW.
    return flat[:B].reshape(B, img_c, img_w, img_h)


if __name__ == "__main__":
    # Small deterministic shapes consistent with the module's docstring.
    BATCH = 2
    ENCODING_DIM = 32
    IMG_C, IMG_W, IMG_H = 3, 16, 16
    OUT_DIM = IMG_C * IMG_W * IMG_H  # 768

    key = jax.random.PRNGKey(0)
    k_v, k_w, k_b = jax.random.split(key, 3)

    # Latent input (Batch_size, encoding_dim)
    v = jax.random.normal(k_v, (BATCH, ENCODING_DIM), dtype=jnp.float32)

    # Deterministic synthetic Linear parameters (PyTorch-style uniform init).
    bound = 1.0 / (ENCODING_DIM ** 0.5)
    W = jax.random.uniform(k_w, (ENCODING_DIM, OUT_DIM),
                           minval=-bound, maxval=bound, dtype=jnp.float32)
    b = jax.random.uniform(k_b, (OUT_DIM,),
                           minval=-bound, maxval=bound, dtype=jnp.float32)

    # max_tn=256 so the demo exercises a multi-tile N grid (768 = 3 x 256).
    x = decoder_forward(v, W, b, IMG_C, IMG_W, IMG_H, max_tn=256)
    x = jax.block_until_ready(x)

    # Sanity checks against a bf16-quantized pure-JAX reference and the f32 ref.
    v_q = v.astype(jnp.bfloat16).astype(jnp.float32)
    W_q = W.astype(jnp.bfloat16).astype(jnp.float32)
    ref = jax.nn.sigmoid(v_q @ W_q + b[None, :]).reshape(BATCH, IMG_C, IMG_W, IMG_H)
    ref_f32 = jax.nn.sigmoid(v @ W + b[None, :]).reshape(BATCH, IMG_C, IMG_W, IMG_H)

    assert x.shape == (BATCH, IMG_C, IMG_W, IMG_H)
    assert x.dtype == jnp.float32
    assert jnp.allclose(x, ref, atol=5e-3, rtol=0), "mismatch vs bf16-quantized ref"
    assert jnp.allclose(x, ref_f32, atol=3e-2, rtol=0), "mismatch vs f32 ref"

    print("KERNEL_OK")
</pallas_src>

<mosaic_0001>
module attributes {stable_mosaic.version = 11 : i64} {
  func.func @decoder_kernel(%arg0: i32, %arg1: i32, %arg2: memref<8x32xbf16, #tpu.memory_space<vmem>>, %arg3: memref<32x256xbf16, #tpu.memory_space<vmem>>, %arg4: memref<1x256xf32, #tpu.memory_space<vmem>>, %arg5: memref<8x256xf32, #tpu.memory_space<vmem>>) attributes {dimension_semantics = [#tpu.dimension_semantics<parallel>, #tpu.dimension_semantics<parallel>], iteration_bounds = array<i64: 1, 3>, scalar_prefetch = 0 : i64, scratch_operands = 0 : i64, tpu.core_type = #tpu.core_type<tc>, window_params = [{transform_indices = @transform_0, window_bounds = array<i64: 8, 32>}, {transform_indices = @transform_1, window_bounds = array<i64: 32, 256>}, {transform_indices = @transform_2, window_bounds = array<i64: 1, 256>}, {transform_indices = @transform_3, window_bounds = array<i64: 8, 256>}]} {
    %c0 = arith.constant 0 : index
    %c0_0 = arith.constant 0 : index
    %0 = vector.load %arg2[%c0, %c0_0] : memref<8x32xbf16, #tpu.memory_space<vmem>>, vector<8x32xbf16>
    %c0_1 = arith.constant 0 : index
    %c0_2 = arith.constant 0 : index
    %1 = vector.load %arg3[%c0_1, %c0_2] : memref<32x256xbf16, #tpu.memory_space<vmem>>, vector<32x256xbf16>
    %cst = arith.constant dense<0.000000e+00> : vector<8x256xf32>
    %2 = tpu.matmul %0, %1, %cst {dimension_numbers = #tpu.dot_dimension_numbers<[1], [0], [0], [1], [0, 0, 1, 1], [], []>} : vector<8x32xbf16>, vector<32x256xbf16>, vector<8x256xf32> -> vector<8x256xf32>
    %c0_3 = arith.constant 0 : index
    %c0_4 = arith.constant 0 : index
    %3 = vector.load %arg4[%c0_3, %c0_4] : memref<1x256xf32, #tpu.memory_space<vmem>>, vector<1x256xf32>
    %4 = vector.broadcast %3 : vector<1x256xf32> to vector<8x256xf32>
    %5 = arith.addf %2, %4 : vector<8x256xf32>
    %6 = arith.negf %5 : vector<8x256xf32>
    %7 = math.exp %6 : vector<8x256xf32>
    %cst_5 = arith.constant 1.000000e+00 : f32
    %8 = vector.broadcast %cst_5 : f32 to vector<8x256xf32>
    %9 = arith.addf %8, %7 : vector<8x256xf32>
    %10 = arith.divf %8, %9 : vector<8x256xf32>
    %c0_6 = arith.constant 0 : index
    %c0_7 = arith.constant 0 : index
    %11 = vector.load %arg5[%c0_6, %c0_7] : memref<8x256xf32, #tpu.memory_space<vmem>>, vector<8x256xf32>
    tpu.vector_store %arg5[%c0_6, %c0_7], %10 {strides = array<i32>} : memref<8x256xf32, #tpu.memory_space<vmem>>, vector<8x256xf32>,
    return
  }
  func.func @transform_0(%arg0: i32, %arg1: i32) -> (i32, i32) {
    %c0_i32 = arith.constant 0 : i32
    %c0_i32_0 = arith.constant 0 : i32
    return %arg0, %c0_i32 : i32, i32
  }
  func.func @transform_1(%arg0: i32, %arg1: i32) -> (i32, i32) {
    %c0_i32 = arith.constant 0 : i32
    %c0_i32_0 = arith.constant 0 : i32
    return %c0_i32, %arg1 : i32, i32
  }
  func.func @transform_2(%arg0: i32, %arg1: i32) -> (i32, i32) {
    %c0_i32 = arith.constant 0 : i32
    %c0_i32_0 = arith.constant 0 : i32
    return %c0_i32, %arg1 : i32, i32
  }
  func.func @transform_3(%arg0: i32, %arg1: i32) -> (i32, i32) {
    %c0_i32 = arith.constant 0 : i32
    return %arg0, %arg1 : i32, i32
  }
}

</mosaic_0001>

<bundles_post_ra>
// kernel: tpu_custom_call.1
= control target key start
LH: loop header
LB: loop body
LE: loop exit
PB: predicated region body
PF: predicated region fallthrough
CT: control target
= control target key end

     0   :  { %8 = vsyncpa [#allocation3], 0  ;;  %s975_s0 = inlined_call_operand.hbm [shape: bf16[8,32], index: 0, kind: input, shape index: {}]   ;;  %s976_s1 = inlined_call_operand.hbm [shape: bf16[32,768], index: 1, kind: input, shape index: {}]   ;;  %s977_s2 = inlined_call_operand.vmem [shape: f32[1,768], index: 2, kind: input, shape index: {}]   ;;  %s978_s3 = inlined_call_operand.hbm [shape: f32[8,768], index: 3, kind: output, shape index: {}]  }
   0x1   :  { %9 = vsyncpa [#allocation6], 0 }
   0x2   :  { %11 = vsyncpa [#allocation6 + $0x1], 0 }
   0x3   :  { %12 = vsyncpa [#allocation4], 0 }
   0x4   :  { %14 = vsyncpa [#allocation4 + $0x1], 0  ;;  %s753_s12 = smov 0   ;;  %s755_s13 = smov 0  }
   0x5   :  { %s757_s14 = smov 0   ;;  %s759_s15 = smov 0  }
   0x6   :  { %s761_s16 = smov 0   ;;  %s763_s17 = smov 0  }
   0x7 LB: > { %s462_s18 = sadd.s32 4294967295, %s724_s17   ;;  %s463_s19 = sadd.s32 4294967294, %s724_s17   ;;  %s724_s17 = sphi %s763_s17, %s20_s17   ;;  %s720_s16 = sphi %s761_s16, %s1005_s16   ;;  %s716_s15 = sphi %s759_s15, %s1004_s15   ;;  %s712_s14 = sphi %s757_s14, %s1003_s14   ;;  %s708_s13 = sphi %s755_s13, %s1002_s13   ;;  %s704_s12 = sphi %s753_s12, %s1001_s12  }
   0x8   : > { %s65_s20 = sadd.s32 1, %s712_s14  ;;  %p72_p0 = scmp.ne.s32.totalorder %s712_s14, %s708_s13 }
   0x9   : > { %p73_p1 = scmp.eq.s32.totalorder %s724_s17, 0  ;;  %p78_p2 = scmp.ne.s32.totalorder %s708_s13, %s704_s12 }
   0xa   : > { %p791_p3 = scmp.eq.s32.totalorder %s462_s18, 0  ;;  %p130_p4 = scmp.eq.s32.totalorder %s462_s18, 2 }
   0xb   : > { %p795_p5 = por %p73_p1, %p72_p0  ;;  %p136_p6 = scmp.eq.s32.totalorder %s463_s19, 2 }
   0xc   : > { %s985_s21 = scalar_select %p791_p3, 1, 0 }
   0xd   : > { %p801_p7 = por %p791_p3, %p78_p2  ;;  %p805_p8 = por %p130_p4, %p72_p0 }
   0xe   : > { %p809_p9 = por %p136_p6, %p78_p2  ;;  %p464_p10 = scmp.ge.s32.totalorder %s724_s17, 1 }
   0xf   : > { %s987_s23 = scalar_select %p801_p7, 1, 0 }
  0x10   : > { %s988_s24 = scalar_select %p805_p8, 1, 0 }
  0x11   : > { %s989_s25 = scalar_select %p809_p9, 1, 0 }
  0x12   : > { %p143_p11 = scmp.lt.s32.totalorder %s724_s17, 4  ;;  %s726_s27 = smov [#allocation2]  }
  0x13   : > { %s158_s28 = sshll.u32 %s726_s27, 4  ;;  %p510_p13 = scmp.lt.s32.totalorder %s724_s17, 3  ;;  %s159_s28 = int_to_ptr.vmem [resolvable:$true] %s158_s28 }
  0x14   : > { %p815_p12 = pnand %p464_p10, %p143_p11  ;;  %s29_s4 = sadd.s32 1, %s720_s16 }
  0x15   : > { %p824_p1 = pnand %p510_p13, %p795_p5  ;;  %p835_p4 = scmp.ge.s32.totalorder %s29_s4, 3 }
  0x16   : > { %s990_s26 = scalar_select %p815_p12, 1, 0 }
  0x17   : > { %p497_p0 = pneg %p815_p12  ;;  %s169_s6 = sand.u32 1, %s712_s14  }
  0x18   : > { %s991_s29 = scalar_select %p824_p1, 1, 0 }
  0x19   : > { %p830_p2 = pnand %p497_p0, %p791_p3  ;;  %s580_s9 = scalar_lea.hbm %s975_s0, 64 }
  0x1a   : > { %s993_s5 = scalar_select %p835_p4, 1, 0 }
  0x1b   : > { %p581_p5 = scmp.ne.s32.totalorder %s975_s0, %s580_s9  ;;  %p582_p6 = pneg %p830_p2 }
  0x1c   : > { %p587_p13 = scmp.lt.u32.totalorder %s580_s9, %s975_s0 }
  0x1d   : > { %p583_p10 = pnand %p582_p6, %p581_p5 }
  0x1f   : > { %p584_p11 = pneg %p583_p10 }
  0x21   : > { %p589_p0 = pnand %p587_p13, %p584_p11 }
  0x23   : > { %592 = shalt.err (!%p589_p0)
}
  0x24   : > { %s593_s22 = scalar_lea.vmem %s159_s28, 64  ;;  %p601_p3 = scmp.lt.s32.totalorder %s159_s28, %s159_s28 }
  0x25   : > { %p594_p9 = scmp.ne.s32.totalorder %s159_s28, %s593_s22  ;;  %p602_p12 = scmp.lt.s32.totalorder %s593_s22, %s593_s22 }
  0x27   : > { %p596_p8 = pnand %p594_p9, %p582_p6  ;;  %p603_p1 = por %p602_p12, %p601_p3 }
  0x29   : > { %p597_p7 = pneg %p596_p8 }
  0x2b   : > { %p604_p4 = pnand %p603_p1, %p597_p7 }
  0x2d   : > { %607 = shalt.err (!%p604_p4)
}
  0x2e   : > { %500 = dma.hbm_to_vmem [thread:$0]  (!%p830_p2), %s975_s0, 64, %s159_s28, [#allocation3]  }
  0x2f   : > { %p994_p9 = scmp.ne.s32.totalorder %s993_s5, 0  ;;  %s467_s8 = sshll.u32 %s169_s6, 5 }
  0x30   : > { %s487_s10 = sshll.u32 %s720_s16, 7  ;;  %s173_s19 = scalar_lea.vmem [#allocation5], %s467_s8 }
  0x31   : > { %s1007_s4 = smov (%p994_p9, %s29_s4), 0  ;;  %s866_s18 = scalar_lea.hbm %s976_s1, %s487_s10 }
  0x32   : > { %s62_s9 = ssub.s32 %s720_s16, %s1007_s4  ;;  %s180_s22 = sshll.u32 %s173_s19, 4  ;;  %s873_s22 = int_to_ptr.vmem [resolvable:$true] %s180_s22 }
  0x33   : > { %p63_p3 = scmp.eq.s32.totalorder %s62_s9, 0  ;;  %s875_s5 = scalar_lea.sflag [#allocation6], %s169_s6 }
  0x34   : > { %s608_s27 = scalar_lea.hbm %s866_s18, 512  ;;  %p995_p8 = scmp.ne.s32.totalorder %s991_s29, 0 }
  0x35   : > { %s871_s28 = scalar_select %p63_p3, %s712_s14, %s65_s20  }
  0x36   : > { %p609_p7 = scmp.ne.s32.totalorder %s866_s18, %s608_s27  ;;  %p610_p12 = pneg %p995_p8 }
  0x37   : > { %s613_s8 = scalar_lea.hbm %s976_s1, 1536  ;;  %p614_p4 = scmp.lt.u32.totalorder %s866_s18, %s976_s1 }
  0x38   : > { %p611_p1 = pnand %p610_p12, %p609_p7  ;;  %p615_p5 = scmp.lt.u32.totalorder %s613_s8, %s608_s27 }
  0x39   : > { %p617_p10 = scmp.lt.u32.totalorder %s608_s27, %s866_s18 }
  0x3a   : > { %p612_p2 = pneg %p611_p1  ;;  %p616_p6 = por %p615_p5, %p614_p4 }
  0x3c   : > { %p618_p11 = por %p617_p10, %p616_p6 }
  0x3e   : > { %p619_p13 = pnand %p618_p11, %p612_p2 }
  0x40   : > { %622 = shalt.err (!%p619_p13)
}
  0x41   : > { %s623_s20 = scalar_lea.vmem %s873_s22, 512  ;;  %s727_s6 = smov [#allocation5]  }
  0x42   : > { %p624_p0 = scmp.ne.s32.totalorder %s873_s22, %s623_s20  ;;  %s628_s11 = sshll.u32 %s727_s6, 4  ;;  %s629_s11 = int_to_ptr.vmem [resolvable:$false] %s628_s11 }
  0x43   : > { %s630_s19 = scalar_lea.vmem %s629_s11, 1024  ;;  %p631_p7 = scmp.lt.s32.totalorder %s873_s22, %s629_s11 }
  0x44   : > { %p626_p9 = pnand %p624_p0, %p610_p12  ;;  %p632_p1 = scmp.lt.s32.totalorder %s630_s19, %s623_s20 }
  0x46   : > { %p627_p3 = pneg %p626_p9  ;;  %p633_p4 = por %p632_p1, %p631_p7 }
  0x48   : > { %p634_p5 = pnand %p633_p4, %p627_p3 }
  0x4a   : > { %637 = shalt.err (!%p634_p5)
}
  0x4b   : > { %s728_s27 = smov 384   ;;  %s729_s7 = smov 128  }
  0x4c   : > { %s730_s9 = smov 8   ;;  %p996_p12 = scmp.ne.s32.totalorder %s990_s26, 0 }
  0x4d   : > { %504 = dma.hbm_to_vmem [thread:$0]  (!%p995_p8), %s866_s18, 512, %s873_s22, %s875_s5, %s728_s27, %s729_s7, %s730_s9  }
  0x4e   : > { %200 = sbr.rel (%p996_p12) target bundleno = 354 (0x162), region = 32  ;;  %p997_p2 = scmp.ne.s32.totalorder (!%p996_p12), %s985_s21, 0 }
  0x55   : > { %691 = dma.done.wait (%p997_p2), [#allocation3], 64  }
  0x56   : > { %693 = vsyncadd (%p997_p2), [#allocation3], 4294967232  ;;  %s910_s8 = sand.u32 1, %s708_s13   ;;  %p998_p6 = scmp.ne.s32.totalorder %s987_s23, 0 }
  0x57   : > { %s472_s10 = sshll.u32 %s910_s8, 5  ;;  %s207_s30 = scalar_lea.sflag [#allocation6], %s910_s8 }
  0x58   : > { %s210_s20 = scalar_lea.vmem [#allocation5], %s472_s10 }
  0x59   : > { %695 = dma.done.wait (%p998_p6), %s207_s30, 512  }
  0x5a   : > { %697 = vsyncadd (%p998_p6), %s207_s30, 4294966784  ;;  %v731_v0 = vmov 0   ;;  %v566_v1 = vld [vmem:[%s210_s20 + $0x4] ss:$8 sps:$4 sm:$0xff]   ;;  %v568_v2 = vld [vmem:[%s210_s20] ss:$8 sps:$4 sm:$0xff]   ;;  %v252_v6 = vlaneseq }
  0x5b   : > { %318 = vmatprep.mubr.bf16.mxu0 %v731_v0  ;;  %286 = vmatprep.subr.bf16.mxu0 %v566_v1  ;;  %v569_v3 = vld [vmem:[%s210_s20 + $0x14] ss:$8 sps:$4 sm:$0xff]   ;;  %v571_v4 = vld [vmem:[%s210_s20 + $0x10] ss:$8 sps:$4 sm:$0xff]   ;;  %vm282_vm0 = vcmask 261120   ;;  %s474_s21 = sshll.u32 %s716_s15, 1 }
  0x5c   : > { %287 = vmatpush1.bf16.msra.mxu0 %v568_v2  ;;  %v245_v5 = vld [vmem:[#allocation2] sm:$0xf]  ;;  %p239_p8 = scmp.lt.s32.totalorder %s474_s21, 5  ;;  %v253_v7 = vshrl.u32 %v252_v6, 7  ;;  %s473_s18 = sshll.u32 %s910_s8, 4 }
  0x5d   : > { %288 = vmatprep.subr.bf16.mxu0 %v569_v3  ;;  %s488_s22 = sshll.u32 %s716_s15, 8  ;;  %s236_s5 = scalar_lea.vmem [#allocation7], %s473_s18 }
  0x5e   : > { %s1009_s21 = smov (!%p239_p8, %s474_s21), 5  ;;  %v254_v8 = vsub.s32 0, %v253_v7  ;;  %v258_v10 = vsub.s32 1, %v253_v7  ;;  %s358_s6 = sshll.u32 %s236_s5, 4  ;;  %s929_s6 = int_to_ptr.vmem [resolvable:$true] %s358_s6 }
  0x5f   : > { %s241_s29 = scalar_lea.vmem %s977_s2, %s1009_s21  ;;  %s927_s27 = scalar_lea.hbm %s978_s3, %s488_s22 }
  0x60   : > { %289 = vmatpush1.bf16.msra.mxu0 %v571_v4  ;;  %v250_v9 = vld [vmem:[%s241_s29] sm:$0x3]  ;;  %s342_s7 = scalar_lea.sflag [#allocation4], %s910_s8  ;;  %s638_s9 = scalar_lea.vmem %s929_s6, 256 }
  0x61   : > { %v255_v11 = vrot.slane %v250_v9, %v254_v8  ;;  %v259_v12 = vrot.slane %v250_v9, %v258_v10  ;;  %p639_p10 = scmp.ne.s32.totalorder %s929_s6, %s638_s9  ;;  %p999_p11 = scmp.ne.s32.totalorder %s988_s24, 0 }
  0x62   : > { %s732_s15 = smov [#allocation7]  }
  0x63   : > { %479 = vmatmul.mubr.msk.bf16.vlgmr.msra.gmra.mrb[0].mxu0 %vm282_vm0, %v245_v5  ;;  %p640_p13 = pnand %p639_p10, %p999_p11  ;;  %s642_s10 = sshll.u32 %s732_s15, 4  ;;  %s643_s10 = int_to_ptr.vmem [resolvable:$false] %s642_s10 }
  0x64   : > { %s644_s30 = scalar_lea.vmem %s643_s10, 512  ;;  %p645_p9 = scmp.lt.s32.totalorder %s929_s6, %s643_s10 }
  0x65   : > { %p641_p0 = pneg %p640_p13  ;;  %p646_p3 = scmp.lt.s32.totalorder %s644_s30, %s638_s9 }
  0x67   : > { %p647_p7 = por %p646_p3, %p645_p9 }
  0x69   : > { %p648_p1 = pnand %p647_p7, %p641_p0 }
 0x136   : > { %v320_v13 = vpop.f32.mrb[0].mxu0 }
 0x137   : > { %v321_v14 = vadd.f32 %v320_v13, %v255_v11  ;;  %v322_v15 = vpop.f32.mrb[1].mxu0 }
 0x138   : > { %v323_v16 = vadd.f32 %v322_v15, %v259_v12  ;;  %v324_v17 = vpop.f32.mrb[2].mxu0 }
 0x139   : > { %v480_v18 = vmul.f32 -1.442695, %v321_v14  ;;  %v325_v19 = vpop.f32.mrb[3].mxu0 }
 0x13a   : > { %v481_v20 = vmul.f32 -1.442695, %v323_v16 }
 0x13b   : > { %572 = vpow2.f32 %v480_v18 }
 0x13c   : > { %574 = vpow2.f32 %v481_v20 }
 0x145   : > { %v573_v21 = vpop.eup %572 }
 0x146   : > { %v575_v22 = vpop.eup %574  ;;  %v333_v23 = vadd.f32 1.0, %v573_v21 }
 0x147   : > { %v334_v24 = vadd.f32 1.0, %v575_v22 }
 0x148   : > { %576 = vrcp.f32 %v333_v23 }
 0x149   : > { %578 = vrcp.f32 %v334_v24 }
 0x152   : > { %v577_v25 = vpop.eup %576 }
 0x153   : > { %v579_v26 = vpop.eup %578  ;;  %339 = vst [vmem:[%s236_s5] sm:$0xff] %v577_v25 }
 0x154   : > { %340 = vst [vmem:[%s236_s5 + $0x8] sm:$0xff] %v579_v26 }
 0x155   : > { %651 = shalt.err (!%p648_p1)
}
 0x156   : > { %s652_s8 = scalar_lea.hbm %s927_s27, 256  ;;  %s656_s23 = scalar_lea.hbm %s978_s3, 768 }
 0x157   : > { %p653_p4 = scmp.ne.s32.totalorder %s927_s27, %s652_s8  ;;  %p657_p2 = scmp.lt.u32.totalorder %s927_s27, %s978_s3 }
 0x158   : > { %p658_p6 = scmp.lt.u32.totalorder %s656_s23, %s652_s8  ;;  %p660_p10 = scmp.lt.u32.totalorder %s652_s8, %s927_s27 }
 0x159   : > { %p654_p5 = pnand %p653_p4, %p999_p11 }
 0x15a   : > { %p659_p8 = por %p658_p6, %p657_p2 }
 0x15b   : > { %p655_p12 = pneg %p654_p5 }
 0x15c   : > { %p661_p13 = por %p660_p10, %p659_p8 }
 0x15e   : > { %p662_p0 = pnand %p661_p13, %p655_p12 }
 0x160   : > { %665 = shalt.err (!%p662_p0)
}
 0x161   : > { %495 = dma.vmem_to_hbm [thread:$0]  (%p999_p11), %s929_s6, 256, %s927_s27, %s342_s7  }
 0x162 PF: > { %p512_p9 = scmp.ge.s32.totalorder %s724_s17, 2  ;;  %s370_s18 = sand.u32 1, %s704_s12  }
 0x163   : > { %p1000_p3 = scmp.ne.s32.totalorder %s989_s25, 0  ;;  %s371_s22 = scalar_lea.sflag [#allocation4], %s370_s18 }
 0x165   : > { %p506_p7 = pnand %p512_p9, %p1000_p3 }
 0x167   : > { %699 = dma.done.wait (!%p506_p7), %s371_s22, 256  }
 0x168   : > { %701 = vsyncadd (!%p506_p7), %s371_s22, 4294967040  ;;  %s20_s17 = sadd.s32 1, %s724_s17   ;;  %s1001_s12 = smov %s708_s13 }
 0x169   : > { %p17_p1 = scmp.ge.s32.totalorder %s20_s17, 5   ;;  %s1002_s13 = smov %s712_s14 }
 0x16a   : > { %s1003_s14 = smov %s871_s28  ;;  %s1004_s15 = smov %s720_s16 }
 0x16b   : > { %s1005_s16 = smov %s1007_s4  ;;  %19 = sbr.rel (!%p17_p1) target bundleno = 7 (0x7), region = 86 }
 0x172   :  { %376 = vsyncpa [#allocation3], 1 }
 0x173   :  { %378 = vsyncpa [#allocation3 + $0x1], 1 }
 0x174   :  { %379 = vsyncpa [#allocation6], 1 }
 0x175   :  { %381 = vsyncpa [#allocation6 + $0x1], 1 }
 0x176   :  { %382 = vsyncpa [#allocation4], 1 }
 0x177   :  { %384 = vsyncpa [#allocation4 + $0x1], 1 }

</bundles_post_ra>
